<compile_context>
chip_gen: v7x
topology: tpu7x:2x2x1
jax: 0.10.0
libtpu: 0.0.40
codegen_flags: <defaults>
</compile_context>

<pallas_src>
import functools
import math

import jax
import jax.numpy as jnp
from jax.experimental import pallas as pl
from jax.experimental.pallas import tpu as pltpu


def _make_embed_kernel(reps, t_add, n_out):
    """reps = rows-per-tile // rows-of-add-table (position pattern repeats)."""

    def kernel(s_ref, r_ref, a_ref, ws_ref, wr_ref, wa_ref, add_ref, o_ref):
        # Three small-K MXU dots into the same packed (tm, 3*d_model) lane
        # layout (weights are lane-expanded with zeros outside their slot).
        y = jnp.dot(s_ref[...], ws_ref[...], preferred_element_type=jnp.float32)
        y = y + jnp.dot(r_ref[...], wr_ref[...], preferred_element_type=jnp.float32)
        y = y + jnp.dot(a_ref[...], wa_ref[...], preferred_element_type=jnp.float32)
        if reps > 1:
            # Bias + positional table is only t_add rows; broadcast it over the
            # `reps` whole sequences inside this tile (sublane split is t_add,
            # a multiple of 8, so the reshape is layout-clean).
            y = y.reshape(reps, t_add, n_out) + add_ref[...][None, :, :]
            y = y.reshape(reps * t_add, n_out)
        else:
            y = y + add_ref[...]
        o_ref[...] = y.astype(o_ref.dtype)

    return kernel


def _choose_row_tile(B, T, bytes_per_row, vmem_tile_budget=16 << 20,
                     target_rows=1024):
    """Rows per grid step.

    Sized from the VMEM / HBM-roofline budget (512-1024 rows is past the
    measured bandwidth knee), decoupled from lcm(T, 8).  Invariant needed by
    the positional-table indexing: T | tm  or  tm | T.
    """
    m = B * T
    cap = max(8, min(target_rows, vmem_tile_budget // max(1, bytes_per_row)))
    if m <= cap:
        return m                                   # single full-dim tile
    base = (T * 8) // math.gcd(T, 8)               # smallest tm with T|tm, 8|tm
    if base <= cap:
        tm = (cap // base) * base
        t = tm
        while t >= base and m % t:                 # prefer exact division of B*T
            t -= base
        return t if t >= base else tm
    # Long-sequence regime: tile inside one sequence (tm | T, 8 | tm).
    t = (cap // 8) * 8
    while t > 8 and T % t:
        t -= 8
    if t >= 8 and T % t == 0:
        return t
    # Pathological T (no 8-aligned divisor within budget): one sequence/tile.
    return base


def build_embed_constants(params):
    """One-time prep (hoisted out of the forward path).

    Lane-expanded projection weights (state/return/action each mapped to its
    own d_model lane slot of the packed 3*d_model output) and the fused
    bias + positional-embedding table.
    """
    d = params["pos"].shape[-1]
    T = params["pos"].shape[0]
    state_size = params["ws_t"].shape[0]
    r_size = params["wr_t"].shape[0]
    action_size = params["wa_t"].shape[0]
    n_out = 3 * d

    ws = jnp.zeros((state_size, n_out), jnp.float32).at[:, 0:d].set(params["ws_t"])
    wr = jnp.zeros((r_size, n_out), jnp.float32).at[:, d:2 * d].set(params["wr_t"])
    wa = jnp.zeros((action_size, n_out), jnp.float32).at[:, 2 * d:3 * d].set(params["wa_t"])

    pos = params["pos"]
    add = jnp.concatenate(
        [pos + params["bs"], pos + params["br"], pos + params["ba"]], axis=-1)

    return {"ws": ws, "wr": wr, "wa": wa, "add": add,
            "d_model": d, "seq_len": T}


def decision_transformer_embed(R, s, a, consts, *, out_dtype=jnp.float32):
    """Pallas forward of DecisionTransformer (embedding stage).

    R: (B, T, r_size), s: (B, T, state_size), a: (B, T, action_size)
    returns (B, T, 3, d_model) == stack([s_e, R_e, a_e], 1).permute(0, 2, 1, 3)

    out_dtype=jnp.bfloat16 halves output HBM traffic if the downstream
    transformer consumes bf16 (MXU accumulation stays f32).
    """
    B, T, r_size = R.shape
    state_size = s.shape[-1]
    action_size = a.shape[-1]
    d = consts["d_model"]
    n_out = 3 * d
    K = state_size + r_size + action_size
    m = B * T

    # Free views (leading-dim collapse): no extra HBM pass.
    s2 = s.reshape(m, state_size)
    r2 = R.reshape(m, r_size)
    a2 = a.reshape(m, action_size)

    bytes_per_row = 2 * (K + n_out) * 4          # double-buffered in + out tiles
    tm = _choose_row_tile(B, T, bytes_per_row)

    add = consts["add"]                          # (T, n_out)
    if tm % T == 0 and T % 8 == 0:
        # Resident T-row table, broadcast in-kernel over tm//T repeats.
        reps, t_add = tm // T, T
        add_arr = add
        add_index_map = lambda i: (0, 0)
    elif tm % T == 0:
        # T not sublane-aligned: fall back to a tm-row table (rare, small).
        reps, t_add = 1, tm
        add_arr = jnp.tile(add, (tm // T, 1))
        add_index_map = lambda i: (0, 0)
    else:
        # Long-sequence regime: tm | T, each tile sits inside one sequence.
        reps, t_add = 1, tm
        seq_tiles = T // tm
        add_arr = add
        add_index_map = lambda i, n=seq_tiles: (i % n, 0)

    m_pad = pl.cdiv(m, tm) * tm
    if m_pad != m:                               # rare: no divisor-friendly tm
        pad = ((0, m_pad - m), (0, 0))
        s2, r2, a2 = jnp.pad(s2, pad), jnp.pad(r2, pad), jnp.pad(a2, pad)

    footprint = (2 * tm * (K + n_out)            # double-buffered in/out tiles
                 + 2 * K * n_out                 # resident weights
                 + 2 * t_add * n_out) * 4        # resident bias+pos table
    vmem_limit = int(min(48 << 20, max(32 << 20, footprint + (8 << 20))))

    out_flat = pl.pallas_call(
        _make_embed_kernel(reps, t_add, n_out),
        out_shape=jax.ShapeDtypeStruct((m_pad, n_out), out_dtype),
        grid_spec=pl.GridSpec(
            grid=(m_pad // tm,),
            in_specs=[
                pl.BlockSpec((tm, state_size), lambda i: (i, 0)),
                pl.BlockSpec((tm, r_size), lambda i: (i, 0)),
                pl.BlockSpec((tm, action_size), lambda i: (i, 0)),
                pl.BlockSpec((state_size, n_out), lambda i: (0, 0)),   # resident
                pl.BlockSpec((r_size, n_out), lambda i: (0, 0)),       # resident
                pl.BlockSpec((action_size, n_out), lambda i: (0, 0)),  # resident
                pl.BlockSpec((t_add, n_out), add_index_map),           # bias+pos
            ],
            out_specs=pl.BlockSpec((tm, n_out), lambda i: (i, 0)),
        ),
        compiler_params=pltpu.CompilerParams(
            dimension_semantics=("parallel",),
            vmem_limit_bytes=vmem_limit),
    )(s2, r2, a2, consts["ws"], consts["wr"], consts["wa"], add_arr)

    if m_pad != m:
        out_flat = out_flat[:m]
    # n_out == 3*d_model exactly (no lane padding) -> this reshape is a view.
    return out_flat.reshape(B, T, 3, d)


def init_params(key, r_size, state_size, action_size, d_model, seq_len):
    ks = jax.random.split(key, 7)
    scale = 0.02
    return {
        "wr_t": scale * jax.random.normal(ks[0], (r_size, d_model), jnp.float32),
        "br":   scale * jax.random.normal(ks[1], (d_model,), jnp.float32),
        "ws_t": scale * jax.random.normal(ks[2], (state_size, d_model), jnp.float32),
        "bs":   scale * jax.random.normal(ks[3], (d_model,), jnp.float32),
        "wa_t": scale * jax.random.normal(ks[4], (action_size, d_model), jnp.float32),
        "ba":   scale * jax.random.normal(ks[5], (d_model,), jnp.float32),
        "pos":  scale * jax.random.normal(ks[6], (seq_len, d_model), jnp.float32),
    }
    # TODO(synk): transformer decoder / output_layer params exist in __init__
    # but are never used by forward(), so they are intentionally not built.


def reference(R, s, a, params):
    pos = params["pos"]
    s_e = s @ params["ws_t"] + params["bs"] + pos
    R_e = R @ params["wr_t"] + params["br"] + pos
    a_e = a @ params["wa_t"] + params["ba"] + pos
    stacked = jnp.stack([s_e, R_e, a_e], axis=1)         # (B, 3, T, D)
    return jnp.transpose(stacked, (0, 2, 1, 3))          # (B, T, 3, D)


if __name__ == "__main__":
    B, T = 2, 8
    r_size, state_size, action_size, d_model = 4, 16, 8, 32

    key = jax.random.PRNGKey(0)
    kR, ks, ka, kp = jax.random.split(key, 4)

    R = jax.random.normal(kR, (B, T, r_size), jnp.float32)
    s = jax.random.normal(ks, (B, T, state_size), jnp.float32)
    a = jax.random.normal(ka, (B, T, action_size), jnp.float32)
    t = jnp.arange(T)  # unused by forward(), kept for interface parity

    params = init_params(kp, r_size, state_size, action_size, d_model, T)
    consts = build_embed_constants(params)   # one-time prep, hoisted off the hot path

    fwd = jax.jit(functools.partial(decision_transformer_embed, consts=consts))
    out = fwd(R, s, a)
    jax.block_until_ready(out)

    ref = reference(R, s, a, params)
    assert out.shape == (B, T, 3, d_model), out.shape
    assert jnp.allclose(out, ref, atol=1e-5, rtol=1e-5), "mismatch vs reference"

    print("KERNEL_OK")
</pallas_src>

<mosaic_0001>
module attributes {stable_mosaic.version = 11 : i64} {
  func.func @kernel(%arg0: i32, %arg1: memref<16x16xf32, #tpu.memory_space<vmem>>, %arg2: memref<16x4xf32, #tpu.memory_space<vmem>>, %arg3: memref<16x8xf32, #tpu.memory_space<vmem>>, %arg4: memref<16x96xf32, #tpu.memory_space<vmem>>, %arg5: memref<4x96xf32, #tpu.memory_space<vmem>>, %arg6: memref<8x96xf32, #tpu.memory_space<vmem>>, %arg7: memref<8x96xf32, #tpu.memory_space<vmem>>, %arg8: memref<16x96xf32, #tpu.memory_space<vmem>>) attributes {dimension_semantics = [#tpu.dimension_semantics<parallel>], iteration_bounds = array<i64: 1>, scalar_prefetch = 0 : i64, scratch_operands = 0 : i64, tpu.core_type = #tpu.core_type<tc>, window_params = [{transform_indices = @transform_0, window_bounds = array<i64: 16, 16>}, {transform_indices = @transform_1, window_bounds = array<i64: 16, 4>}, {transform_indices = @transform_2, window_bounds = array<i64: 16, 8>}, {pipeline_mode = #tpu.pipeline_mode<synchronous>, transform_indices = @transform_3, window_bounds = array<i64: 16, 96>}, {pipeline_mode = #tpu.pipeline_mode<synchronous>, transform_indices = @transform_4, window_bounds = array<i64: 4, 96>}, {pipeline_mode = #tpu.pipeline_mode<synchronous>, transform_indices = @transform_5, window_bounds = array<i64: 8, 96>}, {pipeline_mode = #tpu.pipeline_mode<synchronous>, transform_indices = @transform_6, window_bounds = array<i64: 8, 96>}, {transform_indices = @transform_7, window_bounds = array<i64: 16, 96>}]} {
    %c0 = arith.constant 0 : index
    %c0_0 = arith.constant 0 : index
    %0 = vector.load %arg1[%c0, %c0_0] : memref<16x16xf32, #tpu.memory_space<vmem>>, vector<16x16xf32>
    %c0_1 = arith.constant 0 : index
    %c0_2 = arith.constant 0 : index
    %1 = vector.load %arg4[%c0_1, %c0_2] : memref<16x96xf32, #tpu.memory_space<vmem>>, vector<16x96xf32>
    %cst = arith.constant dense<0.000000e+00> : vector<16x96xf32>
    %2 = tpu.matmul %0, %1, %cst {dimension_numbers = #tpu.dot_dimension_numbers<[1], [0], [0], [1], [0, 0, 1, 1], [], []>} : vector<16x16xf32>, vector<16x96xf32>, vector<16x96xf32> -> vector<16x96xf32>
    %c0_3 = arith.constant 0 : index
    %c0_4 = arith.constant 0 : index
    %3 = vector.load %arg2[%c0_3, %c0_4] : memref<16x4xf32, #tpu.memory_space<vmem>>, vector<16x4xf32>
    %c0_5 = arith.constant 0 : index
    %c0_6 = arith.constant 0 : index
    %4 = vector.load %arg5[%c0_5, %c0_6] : memref<4x96xf32, #tpu.memory_space<vmem>>, vector<4x96xf32>
    %cst_7 = arith.constant dense<0.000000e+00> : vector<16x96xf32>
    %5 = tpu.matmul %3, %4, %cst_7 {dimension_numbers = #tpu.dot_dimension_numbers<[1], [0], [0], [1], [0, 0, 1, 1], [], []>} : vector<16x4xf32>, vector<4x96xf32>, vector<16x96xf32> -> vector<16x96xf32>
    %6 = arith.addf %2, %5 : vector<16x96xf32>
    %c0_8 = arith.constant 0 : index
    %c0_9 = arith.constant 0 : index
    %7 = vector.load %arg3[%c0_8, %c0_9] : memref<16x8xf32, #tpu.memory_space<vmem>>, vector<16x8xf32>
    %c0_10 = arith.constant 0 : index
    %c0_11 = arith.constant 0 : index
    %8 = vector.load %arg6[%c0_10, %c0_11] : memref<8x96xf32, #tpu.memory_space<vmem>>, vector<8x96xf32>
    %cst_12 = arith.constant dense<0.000000e+00> : vector<16x96xf32>
    %9 = tpu.matmul %7, %8, %cst_12 {dimension_numbers = #tpu.dot_dimension_numbers<[1], [0], [0], [1], [0, 0, 1, 1], [], []>} : vector<16x8xf32>, vector<8x96xf32>, vector<16x96xf32> -> vector<16x96xf32>
    %10 = arith.addf %6, %9 : vector<16x96xf32>
    %11 = vector.shape_cast %10 : vector<16x96xf32> to vector<2x8x96xf32>
    %c0_13 = arith.constant 0 : index
    %c0_14 = arith.constant 0 : index
    %12 = vector.load %arg7[%c0_13, %c0_14] : memref<8x96xf32, #tpu.memory_space<vmem>>, vector<8x96xf32>
    %13 = vector.shape_cast %12 : vector<8x96xf32> to vector<1x8x96xf32>
    %14 = vector.broadcast %13 : vector<1x8x96xf32> to vector<2x8x96xf32>
    %15 = arith.addf %11, %14 : vector<2x8x96xf32>
    %16 = vector.shape_cast %15 : vector<2x8x96xf32> to vector<16x96xf32>
    %c0_15 = arith.constant 0 : index
    %c0_16 = arith.constant 0 : index
    %17 = vector.load %arg8[%c0_15, %c0_16] : memref<16x96xf32, #tpu.memory_space<vmem>>, vector<16x96xf32>
    tpu.vector_store %arg8[%c0_15, %c0_16], %16 {strides = array<i32>} : memref<16x96xf32, #tpu.memory_space<vmem>>, vector<16x96xf32>,
    return
  }
  func.func @transform_0(%arg0: i32) -> (i32, i32) {
    %c0_i32 = arith.constant 0 : i32
    %c0_i32_0 = arith.constant 0 : i32
    return %arg0, %c0_i32 : i32, i32
  }
  func.func @transform_1(%arg0: i32) -> (i32, i32) {
    %c0_i32 = arith.constant 0 : i32
    %c0_i32_0 = arith.constant 0 : i32
    return %arg0, %c0_i32 : i32, i32
  }
  func.func @transform_2(%arg0: i32) -> (i32, i32) {
    %c0_i32 = arith.constant 0 : i32
    %c0_i32_0 = arith.constant 0 : i32
    return %arg0, %c0_i32 : i32, i32
  }
  func.func @transform_3(%arg0: i32) -> (i32, i32) {
    %c0_i32 = arith.constant 0 : i32
    %c0_i32_0 = arith.constant 0 : i32
    %c0_i32_1 = arith.constant 0 : i32
    return %c0_i32, %c0_i32_0 : i32, i32
  }
  func.func @transform_4(%arg0: i32) -> (i32, i32) {
    %c0_i32 = arith.constant 0 : i32
    %c0_i32_0 = arith.constant 0 : i32
    %c0_i32_1 = arith.constant 0 : i32
    return %c0_i32, %c0_i32_0 : i32, i32
  }
  func.func @transform_5(%arg0: i32) -> (i32, i32) {
    %c0_i32 = arith.constant 0 : i32
    %c0_i32_0 = arith.constant 0 : i32
    %c0_i32_1 = arith.constant 0 : i32
    return %c0_i32, %c0_i32_0 : i32, i32
  }
  func.func @transform_6(%arg0: i32) -> (i32, i32) {
    %c0_i32 = arith.constant 0 : i32
    %c0_i32_0 = arith.constant 0 : i32
    %c0_i32_1 = arith.constant 0 : i32
    return %c0_i32, %c0_i32_0 : i32, i32
  }
  func.func @transform_7(%arg0: i32) -> (i32, i32) {
    %c0_i32 = arith.constant 0 : i32
    %c0_i32_0 = arith.constant 0 : i32
    return %arg0, %c0_i32 : i32, i32
  }
}

</mosaic_0001>

<bundles_post_ra>
// kernel: decision_transformer_embed.1
= control target key start
LH: loop header
LB: loop body
LE: loop exit
PB: predicated region body
PF: predicated region fallthrough
CT: control target
= control target key end

     0   :  { %12 = vsyncpa [#allocation3], 0  ;;  %s518_s0 = inlined_call_operand.vmem [shape: f32[16,16], index: 0, kind: input, shape index: {}]   ;;  %s519_s1 = inlined_call_operand.vmem [shape: f32[16,4], index: 1, kind: input, shape index: {}]   ;;  %s520_s2 = inlined_call_operand.vmem [shape: f32[16,8], index: 2, kind: input, shape index: {}]   ;;  %s521_s3 = inlined_call_operand.hbm [shape: f32[16,96], index: 3, kind: input, shape index: {}]   ;;  %s522_s4 = inlined_call_operand.hbm [shape: f32[4,96], index: 4, kind: input, shape index: {}]   ;;  %s523_s5 = inlined_call_operand.vmem [shape: f32[8,96], index: 5, kind: input, shape index: {}]   ;;  %s524_s6 = inlined_call_operand.vmem [shape: f32[8,96], index: 6, kind: input, shape index: {}]   ;;  %s525_s7 = inlined_call_operand.vmem [shape: f32[16,96], index: 7, kind: output, shape index: {}]  }
   0x1   :  { %13 = vsyncpa [#allocation5], 0  ;;  %s420_s24 = smov [#allocation2]   ;;  %s372_s28 = scalar_lea.hbm %s521_s3, 256 }
   0x2   :  { %s25_s25 = sshll.u32 %s420_s24, 4  ;;  %p373_p0 = scmp.ne.s32.totalorder %s521_s3, %s372_s28  ;;  %s26_s25 = int_to_ptr.vmem [resolvable:$true] %s25_s25 }
   0x3   :  { %p376_p1 = scmp.lt.u32.totalorder %s372_s28, %s521_s3 }
   0x5   :  { %p378_p2 = pnand %p376_p1, %p373_p0 }
   0x7   :  { %381 = shalt.err (!%p378_p2)
}
   0x8   :  { %s382_s10 = scalar_lea.vmem %s26_s25, 256  ;;  %p387_p4 = scmp.lt.s32.totalorder %s26_s25, %s26_s25 }
   0x9   :  { %p383_p3 = scmp.ne.s32.totalorder %s26_s25, %s382_s10  ;;  %p388_p5 = scmp.lt.s32.totalorder %s382_s10, %s382_s10 }
   0xb   :  { %p389_p6 = por %p388_p5, %p387_p4 }
   0xd   :  { %p390_p7 = pnand %p389_p6, %p383_p3 }
   0xf   :  { %393 = shalt.err (!%p390_p7)
}
  0x10   :  { %s421_s11 = smov 128   ;;  %s422_s12 = smov 8  }
  0x11   :  { %31 = dma.hbm_to_vmem [thread:$0]  %s521_s3, 256, %s26_s25, [#allocation3], %s421_s11, %s421_s11, %s422_s12  }
  0x12   :  { %s423_s15 = smov [#allocation4]   ;;  %s394_s19 = scalar_lea.hbm %s522_s4, 64 }
  0x13   :  { %s38_s16 = sshll.u32 %s423_s15, 4  ;;  %p395_p8 = scmp.ne.s32.totalorder %s522_s4, %s394_s19  ;;  %s39_s16 = int_to_ptr.vmem [resolvable:$true] %s38_s16 }
  0x14   :  { %p398_p9 = scmp.lt.u32.totalorder %s394_s19, %s522_s4 }
  0x16   :  { %p400_p10 = pnand %p398_p9, %p395_p8 }
  0x18   :  { %403 = shalt.err (!%p400_p10)
}
  0x19   :  { %s404_s24 = scalar_lea.vmem %s39_s16, 64  ;;  %p409_p12 = scmp.lt.s32.totalorder %s39_s16, %s39_s16 }
  0x1a   :  { %p405_p11 = scmp.ne.s32.totalorder %s39_s16, %s404_s24  ;;  %p410_p13 = scmp.lt.s32.totalorder %s404_s24, %s404_s24 }
  0x1c   :  { %p411_p0 = por %p410_p13, %p409_p12 }
  0x1e   :  { %p412_p1 = pnand %p411_p0, %p405_p11 }
  0x20   :  { %415 = shalt.err (!%p412_p1)
}
  0x21   :  { %41 = dma.hbm_to_vmem [thread:$0]  %s522_s4, 64, %s39_s16, [#allocation5]  }
  0x22   :  { %416 = dma.done.wait [#allocation3], 256  }
  0x23   :  { %417 = vsyncadd [#allocation3], 4294967040 }
  0x24   :  { %418 = dma.done.wait [#allocation5], 64  }
  0x25   :  { %419 = vsyncadd [#allocation5], 4294967232  ;;  %vm66_vm0 = vcmask 1043456   ;;  %vm59_vm1 = vcmask 31744   ;;  %v58_v0 = vld [vmem:[#allocation4] sm:$0xf] }
  0x26   :  { %v56_v1 = vld [vmem:[%s519_s1] sm:$0xff]  ;;  %343 = vmatprep.subr.msk.mxu0 %vm66_vm0, %v58_v0  ;;  %v55_v3 = vld [vmem:[#allocation2 + $0x8] sm:$0xff]  ;;  %vm145_vm2 = vcmask 130048   ;;  %vm230_vm3 = vcmask 64512   ;;  %vm317_vm4 = vcmask 785408  }
  0x27   :  { %v54_v2 = vld [vmem:[#allocation2] sm:$0xff]  ;;  %345 = vmatprep.mubr.msk.f32.mxu0 %vm59_vm1, %v56_v1  ;;  %v57_v4 = vld [vmem:[%s519_s1 + $0x8] sm:$0xff]  ;;  %344 = vmatpush3.msk.msra.mxu0 %vm66_vm0, %v58_v0 }
  0x28   :  { %v229_v5 = vld [vmem:[%s523_s5] sm:$0xff]  ;;  %v360_v6 = vpack.c.bf16 %v55_v3, %v54_v2  ;;  %346 = vmatmul.mubr.msk.f32.vlgmr.msra.gmra.mrb[0].mxu0 %vm59_vm1, %v57_v4  ;;  %v228_v9 = vld [vmem:[%s520_s2 + $0x8] sm:$0xff] }
  0x29   :  { %v52_v7 = vld [vmem:[%s518_s0] sm:$0xff]  ;;  %355 = vmatprep.subr.mxu0 %v229_v5  ;;  %v53_v10 = vld [vmem:[%s518_s0 + $0x8] sm:$0xff] }
  0x2a   :  { %v227_v8 = vld [vmem:[%s520_s2] sm:$0xff]  ;;  %361 = vmatprep.subr.bf16.mxu1 %v360_v6  ;;  %356 = vmatpush3.msra.mxu0 %v229_v5 }
  0x2b   :  { %363 = vmatpush3.bf16.msra.mxu1 %v360_v6  ;;  %352 = vmatprep.mubr.msk.f32.mxu1 %vm145_vm2, %v52_v7  ;;  %v314_v19 = vld [vmem:[%s524_s6] sm:$0xff] }
  0x2c   :  { %357 = vmatprep.mubr.msk.f32.mxu0 %vm230_vm3, %v227_v8 }
  0x2d   :  { %358 = vmatmul.mubr.msk.f32.vlgmr.msra.gmra.mrb[2].mxu0 %vm230_vm3, %v228_v9 }
  0x2e   :  { %353 = vmatmul.mubr.msk.f32.vlgmr.msra.gmra.mrb[0].mxu1 %vm145_vm2, %v53_v10 }
  0xfb   :  { %v347_v11 = vpop.f32.mrb[0].mxu0 }
  0xfc   :  { %v136_v12 = vpop.f32.mrb[1].mxu0 }
 0x100   :  { %v359_v13 = vpop.f32.mrb[2].mxu0 }
 0x101   :  { %v354_v14 = vpop.f32.mrb[0].mxu1  ;;  %v303_v15 = vpop.f32.mrb[3].mxu0 }
 0x102   :  { %v224_v16 = vadd.f32 %v354_v14, %v347_v11  ;;  %v218_v17 = vpop.f32.mrb[1].mxu1 }
 0x103   :  { %v219_v18 = vadd.f32 %v218_v17, %v136_v12 }
 0x104   :  { %v313_v20 = vadd.f32 %v359_v13, %v224_v16 }
 0x105   :  { %v312_v21 = vadd.f32 %v303_v15, %v219_v18 }
 0x106   :  { %v316_v22 = vadd.f32 %v314_v19, %v313_v20 }
 0x107   :  { %v315_v23 = vadd.f32 %v314_v19, %v312_v21 }
 0x108   :  { %319 = vst.msk [vmem:[%s525_s7 + $0x8] sm:$0xff] %vm317_vm4, %v316_v22 }
 0x109   :  { %318 = vst.msk [vmem:[%s525_s7] sm:$0xff] %vm317_vm4, %v315_v23 }
 0x10a   :  { %324 = vsyncpa [#allocation3], 1 }
 0x10b   :  { %325 = vsyncpa [#allocation5], 1 }

</bundles_post_ra>
